<compile_context>
chip_gen: v7x
topology: tpu7x:2x2x1
jax: 0.10.0
libtpu: 0.0.40
codegen_flags: <defaults>
</compile_context>

<pallas_src>
import math

import jax
import jax.numpy as jnp
from jax.experimental import pallas as pl
from jax.experimental.pallas import tpu as pltpu


# MXU K-depth used for row packing.  256 matches v6e/v7x (2x256x256); it is
# also correct (and near-optimal) on v5e's 4x128x128 MXU.
# TODO(synk): query the chip generation (pltpu.get_tpu_info) and use 128 on
# v5e to shave LHS lane padding there.
_MXU_DEPTH = 256


def _cdiv(a, b):
    return -(-a // b)


def _round_up(x, m):
    return _cdiv(x, m) * m


def _lane_pad(d):
    return _round_up(d, 128)


def _actor_loc_kernel(x_ref, w_ref, b_ref, loc_ref):
    # x_ref:   [TM, p*K]   packed feature tile (original dtype, e.g. f32)
    # w_ref:   [p*K, p*N]  block-diagonal weight (f32 or bf16)
    # b_ref:   [1, p*N]    tiled bias (f32)
    # loc_ref: [TM, p*N]   packed output (f32)
    x = x_ref[...].astype(w_ref.dtype)          # in-kernel cast (VPU slack)
    loc = jnp.dot(x, w_ref[...], preferred_element_type=jnp.float32)
    loc_ref[...] = (loc + b_ref[...]).astype(loc_ref.dtype)


def prepare_actor_params(weight, bias, actor_std, *, pack=None,
                         compute_dtype=jnp.float32):
    """Pack PyTorch-layout params once (hoisted out of the per-call hot path).

    weight: [N, K] (PyTorch nn.Linear layout), bias: [N], actor_std: [N].

    Builds a block-diagonal weight of shape [p*K, p*N] (p copies of W^T on the
    diagonal) so that p logical rows can be packed into one lane-dense MXU row.
    Must be re-run whenever the underlying parameters change (training).
    """
    N, K = weight.shape
    if pack is None:
        pack = max(1, min(_MXU_DEPTH // K, 32))
    w_t = jnp.transpose(weight).astype(jnp.float32)                 # [K, N]
    w_bd = jnp.kron(jnp.eye(pack, dtype=jnp.float32), w_t)          # [pK, pN]
    return dict(
        w_bd=w_bd.astype(compute_dtype),
        b_bd=jnp.tile(bias.astype(jnp.float32), pack).reshape(1, pack * N),
        w_t=w_t.astype(compute_dtype),                              # XLA path
        b=bias.astype(jnp.float32),
        scale_row=jnp.exp(actor_std.astype(jnp.float32)),
        pack=int(pack),
        action_dim=int(N),
        feat_dim=int(K),
    )


def actor_forward(features, params, *, block_m=1024, force_pallas=False,
                  min_pallas_rows=1024, vmem_budget_bytes=24 << 20):
    """features: [..., K].  Returns (loc [..., N], scale [..., N]).

    block_m is in *packed* rows (p logical rows each).
    """
    *lead, K = features.shape
    N = params["action_dim"]
    assert K == params["feat_dim"], "feature dim mismatch with packed params"
    M = math.prod(lead) if lead else 1
    out_shape = tuple(lead) + (N,)

    # scale = exp(actor_std).expand_as(loc) -- free broadcast outside kernel.
    scale = jnp.broadcast_to(params["scale_row"], out_shape)

    if M < min_pallas_rows and not force_pallas:
        # Tiny PPO inference batches: a standalone pallas_call is pure
        # launch + DMA latency; let XLA fuse the dot into the caller's graph.
        # TODO(synk): fuse this projection into the feature-producer kernel
        # when that producer is itself a Pallas kernel.
        loc = jnp.dot(features.reshape(M, K), params["w_t"],
                      preferred_element_type=jnp.float32) + params["b"]
        return loc.reshape(out_shape), scale

    p = params["pack"]
    Kp, Np = p * K, p * N

    x2d = features.reshape(M, K)                 # NOTE: no dtype cast here.
    M_pad = _round_up(M, p)
    if M_pad != M:
        x2d = jnp.pad(x2d, ((0, M_pad - M), (0, 0)))
    Mp = M_pad // p
    x_packed = x2d.reshape(Mp, Kp)               # contiguous reinterpret

    in_bytes = x_packed.dtype.itemsize
    w_bytes = params["w_bd"].dtype.itemsize
    row_bytes = _lane_pad(Kp) * in_bytes + _lane_pad(Np) * 4

    # Clamp the tile (not the limit) so the double-buffered x+loc footprint
    # stays inside the budget (v7x has only 64 MiB VMEM per TensorCore).
    tm_cap = max(8, (vmem_budget_bytes // (2 * row_bytes)) // 8 * 8)
    block_m = max(8, min(block_m, tm_cap))

    if Mp <= 16:
        tm, grid_m = Mp, 1                       # single full-extent block
    else:
        grid_m = _cdiv(Mp, block_m)
        grid_m = max(grid_m, 2)                  # feed both v7x TensorCores
        if grid_m > 2 and grid_m % 2:
            grid_m += 1                          # even split across 2 TCs
        tm = min(_round_up(_cdiv(Mp, grid_m), 8), _round_up(Mp, 8))
        grid_m = _cdiv(Mp, tm)

    footprint = (2 * tm * row_bytes
                 + 2 * _round_up(Kp, 8) * _lane_pad(Np) * w_bytes
                 + 2 * 8 * _lane_pad(Np) * 4)
    vmem_limit = int(footprint + (8 << 20))      # headroom for compiler scratch

    loc_packed = pl.pallas_call(
        _actor_loc_kernel,
        out_shape=jax.ShapeDtypeStruct((Mp, Np), jnp.float32),
        grid_spec=pltpu.PrefetchScalarGridSpec(
            num_scalar_prefetch=0,
            grid=(grid_m,),
            in_specs=[
                pl.BlockSpec((tm, Kp), lambda i: (i, 0)),
                pl.BlockSpec((Kp, Np), lambda i: (0, 0)),
                pl.BlockSpec((1, Np), lambda i: (0, 0)),
            ],
            out_specs=pl.BlockSpec((tm, Np), lambda i: (i, 0)),
        ),
        compiler_params=pltpu.CompilerParams(
            dimension_semantics=("parallel",),
            vmem_limit_bytes=vmem_limit,
        ),
    )(x_packed, params["w_bd"], params["b_bd"])

    loc = loc_packed.reshape(M_pad, N)[:M].reshape(out_shape)
    return loc, scale


if __name__ == "__main__":
    # Shapes consistent with PPO actor usage: features [batch, n_agents, feat].
    batch, n_agents, feat_dim, action_dim = 2, 8, 32, 4

    key = jax.random.PRNGKey(0)
    k_feat, k_w, k_b, k_big = jax.random.split(key, 4)

    features = jax.random.normal(k_feat, (batch, n_agents, feat_dim), jnp.float32)

    # Deterministic LazyLinear-like init; actor_std = zeros (as in the module).
    bound = 1.0 / math.sqrt(feat_dim)
    weight = jax.random.uniform(k_w, (action_dim, feat_dim), jnp.float32, -bound, bound)
    bias = jax.random.uniform(k_b, (action_dim,), jnp.float32, -bound, bound)
    actor_std = jnp.zeros((action_dim,), jnp.float32)

    # Pure-JAX reference.
    loc_ref = features @ weight.T + bias
    scale_ref = jnp.broadcast_to(jnp.exp(actor_std), loc_ref.shape)

    params = prepare_actor_params(weight, bias, actor_std)  # f32, pack=8

    # 1) Small-M, Pallas path forced (single packed block).
    loc, scale = actor_forward(features, params, force_pallas=True)
    jax.block_until_ready((loc, scale))
    assert loc.shape == loc_ref.shape and scale.shape == scale_ref.shape
    assert jnp.allclose(loc, loc_ref, atol=1e-5), "loc mismatch (f32 pallas)"
    assert jnp.allclose(scale, scale_ref, atol=1e-6), "scale mismatch"

    # 2) Small-M auto-dispatch (XLA fallback path, same semantics).
    loc_x, scale_x = actor_forward(features, params)
    jax.block_until_ready((loc_x, scale_x))
    assert jnp.allclose(loc_x, loc_ref, atol=1e-5), "loc mismatch (xla path)"
    assert jnp.allclose(scale_x, scale_ref, atol=1e-6), "scale mismatch (xla)"

    # 3) Larger ragged M exercising the balanced multi-step grid.
    feats_big = jax.random.normal(k_big, (131, n_agents, feat_dim), jnp.float32)
    loc_b, _ = actor_forward(feats_big, params, block_m=32, force_pallas=True)
    jax.block_until_ready(loc_b)
    loc_b_ref = feats_big @ weight.T + bias
    assert jnp.allclose(loc_b, loc_b_ref, atol=1e-4), "loc mismatch (tiled)"

    # 4) bf16 weight path (features stay f32 in HBM; cast happens in-kernel).
    params_bf = prepare_actor_params(weight, bias, actor_std,
                                     compute_dtype=jnp.bfloat16)
    loc_bf, _ = actor_forward(feats_big, params_bf, block_m=32, force_pallas=True)
    jax.block_until_ready(loc_bf)
    assert jnp.allclose(loc_bf, loc_b_ref, atol=1e-1), "loc mismatch (bf16)"

    print("KERNEL_OK")
</pallas_src>

<mosaic_0001>
module attributes {stable_mosaic.version = 11 : i64} {
  func.func @_actor_loc_kernel(%arg0: i32, %arg1: memref<2x256xf32, #tpu.memory_space<vmem>>, %arg2: memref<256x32xf32, #tpu.memory_space<vmem>>, %arg3: memref<1x32xf32, #tpu.memory_space<vmem>>, %arg4: memref<2x32xf32, #tpu.memory_space<vmem>>) attributes {dimension_semantics = [#tpu.dimension_semantics<parallel>], iteration_bounds = array<i64: 1>, scalar_prefetch = 0 : i64, scratch_operands = 0 : i64, tpu.core_type = #tpu.core_type<tc>, window_params = [{transform_indices = @transform_0, window_bounds = array<i64: 2, 256>}, {pipeline_mode = #tpu.pipeline_mode<synchronous>, transform_indices = @transform_1, window_bounds = array<i64: 256, 32>}, {pipeline_mode = #tpu.pipeline_mode<synchronous>, transform_indices = @transform_2, window_bounds = array<i64: 1, 32>}, {transform_indices = @transform_3, window_bounds = array<i64: 2, 32>}]} {
    %c0 = arith.constant 0 : index
    %c0_0 = arith.constant 0 : index
    %0 = vector.load %arg1[%c0, %c0_0] : memref<2x256xf32, #tpu.memory_space<vmem>>, vector<2x256xf32>
    %c0_1 = arith.constant 0 : index
    %c0_2 = arith.constant 0 : index
    %1 = vector.load %arg2[%c0_1, %c0_2] : memref<256x32xf32, #tpu.memory_space<vmem>>, vector<256x32xf32>
    %cst = arith.constant dense<0.000000e+00> : vector<2x32xf32>
    %2 = tpu.matmul %0, %1, %cst {dimension_numbers = #tpu.dot_dimension_numbers<[1], [0], [0], [1], [0, 0, 1, 1], [], []>} : vector<2x256xf32>, vector<256x32xf32>, vector<2x32xf32> -> vector<2x32xf32>
    %c0_3 = arith.constant 0 : index
    %c0_4 = arith.constant 0 : index
    %3 = vector.load %arg3[%c0_3, %c0_4] : memref<1x32xf32, #tpu.memory_space<vmem>>, vector<1x32xf32>
    %4 = vector.broadcast %3 : vector<1x32xf32> to vector<2x32xf32>
    %5 = arith.addf %2, %4 : vector<2x32xf32>
    %c0_5 = arith.constant 0 : index
    %c0_6 = arith.constant 0 : index
    %6 = vector.load %arg4[%c0_5, %c0_6] : memref<2x32xf32, #tpu.memory_space<vmem>>, vector<2x32xf32>
    tpu.vector_store %arg4[%c0_5, %c0_6], %5 {strides = array<i32>} : memref<2x32xf32, #tpu.memory_space<vmem>>, vector<2x32xf32>,
    return
  }
  func.func @transform_0(%arg0: i32) -> (i32, i32) {
    %c0_i32 = arith.constant 0 : i32
    %c0_i32_0 = arith.constant 0 : i32
    return %arg0, %c0_i32 : i32, i32
  }
  func.func @transform_1(%arg0: i32) -> (i32, i32) {
    %c0_i32 = arith.constant 0 : i32
    %c0_i32_0 = arith.constant 0 : i32
    %c0_i32_1 = arith.constant 0 : i32
    return %c0_i32, %c0_i32_0 : i32, i32
  }
  func.func @transform_2(%arg0: i32) -> (i32, i32) {
    %c0_i32 = arith.constant 0 : i32
    %c0_i32_0 = arith.constant 0 : i32
    %c0_i32_1 = arith.constant 0 : i32
    return %c0_i32, %c0_i32_0 : i32, i32
  }
  func.func @transform_3(%arg0: i32) -> (i32, i32) {
    %c0_i32 = arith.constant 0 : i32
    %c0_i32_0 = arith.constant 0 : i32
    return %arg0, %c0_i32 : i32, i32
  }
}

</mosaic_0001>

<bundles_post_ra>
// kernel: tpu_custom_call.1
= control target key start
LH: loop header
LB: loop body
LE: loop exit
PB: predicated region body
PF: predicated region fallthrough
CT: control target
= control target key end

     0   :  { %s381_s0 = inlined_call_operand.vmem [shape: f32[2,256], index: 0, kind: input, shape index: {}]   ;;  %s382_s1 = inlined_call_operand.vmem [shape: f32[256,32], index: 1, kind: input, shape index: {}]   ;;  %s383_s2 = inlined_call_operand.vmem [shape: f32[1,32], index: 2, kind: input, shape index: {}]   ;;  %s384_s3 = inlined_call_operand.hbm [shape: f32[2,32], index: 3, kind: output, shape index: {}]  }
   0x1   :  { %v32_v0 = vld [vmem:[%s382_s1 + $0x80] sm:$0xff]  ;;  %v33_v1 = vld [vmem:[%s382_s1 + $0x88] sm:$0xff]  ;;  %v34_v5 = vld [vmem:[%s382_s1 + $0x90] sm:$0xff] }
   0x2   :  { %v16_v2 = vld [vmem:[%s382_s1] sm:$0xff]  ;;  %v189_v3 = vpack.c.bf16 %v33_v1, %v32_v0  ;;  %v17_v4 = vld [vmem:[%s382_s1 + $0x8] sm:$0xff]  ;;  %v35_v6 = vld [vmem:[%s382_s1 + $0x98] sm:$0xff] }
   0x3   :  { %v191_v7 = vpack.c.bf16 %v17_v4, %v16_v2  ;;  %v193_v8 = vpack.c.bf16 %v35_v6, %v34_v5  ;;  %v18_v9 = vld [vmem:[%s382_s1 + $0x10] sm:$0xff]  ;;  %v19_v10 = vld [vmem:[%s382_s1 + $0x18] sm:$0xff]  ;;  %v36_v11 = vld [vmem:[%s382_s1 + $0xa0] sm:$0xff] }
   0x4   :  { %190 = vmatprep.subr.bf16.mxu0 %v189_v3  ;;  %v37_v12 = vld [vmem:[%s382_s1 + $0xa8] sm:$0xff]  ;;  %v195_v13 = vpack.c.bf16 %v19_v10, %v18_v9  ;;  %v20_v15 = vld [vmem:[%s382_s1 + $0x20] sm:$0xff]  ;;  %v38_v17 = vld [vmem:[%s382_s1 + $0xb0] sm:$0xff] }
   0x5   :  { %192 = vmatpush3.bf16.msra.mxu0 %v191_v7  ;;  %v197_v14 = vpack.c.bf16 %v37_v12, %v36_v11  ;;  %v21_v16 = vld [vmem:[%s382_s1 + $0x28] sm:$0xff]  ;;  %v39_v18 = vld [vmem:[%s382_s1 + $0xb8] sm:$0xff]  ;;  %v22_v21 = vld [vmem:[%s382_s1 + $0x30] sm:$0xff] }
   0x6   :  { %194 = vmatprep.subr.bf16.mxu0 %v193_v8  ;;  %v199_v19 = vpack.c.bf16 %v21_v16, %v20_v15  ;;  %v201_v20 = vpack.c.bf16 %v39_v18, %v38_v17  ;;  %v23_v22 = vld [vmem:[%s382_s1 + $0x38] sm:$0xff]  ;;  %v40_v23 = vld [vmem:[%s382_s1 + $0xc0] sm:$0xff]  ;;  %v41_v24 = vld [vmem:[%s382_s1 + $0xc8] sm:$0xff] }
   0x7   :  { %v153_v25 = vld.sshfl [vmem:[%s381_s0] sm:$0x33 pattern:$0x76325410] }
   0x8   :  { %v63_v26 = vcombine.high %v153_v25, %v153_v25 }
   0x9   :  { %196 = vmatpush3.bf16.msra.mxu0 %v195_v13 }
   0xa   :  { %198 = vmatprep.subr.bf16.mxu0 %v197_v14 }
   0xb   :  { %8 = vsyncpa [#allocation3], 0  ;;  %v203_v27 = vpack.c.bf16 %v23_v22, %v22_v21  ;;  %v205_v28 = vpack.c.bf16 %v41_v24, %v40_v23  ;;  %v24_v29 = vld [vmem:[%s382_s1 + $0x40] sm:$0xff]  ;;  %v25_v30 = vld [vmem:[%s382_s1 + $0x48] sm:$0xff]  ;;  %130 = vmatprep.mubr.f32.mxu0 %v63_v26  ;;  %s246_s25 = smov [#allocation2]   ;;  %vm136_vm0 = vcmask 254976  }
   0xc   :  { %v42_v31 = vld [vmem:[%s382_s1 + $0xd0] sm:$0xff]  ;;  %v43_v32 = vld [vmem:[%s382_s1 + $0xd8] sm:$0xff]  ;;  %v207_v33 = vpack.c.bf16 %v25_v30, %v24_v29  ;;  %v44_v37 = vld [vmem:[%s382_s1 + $0xe0] sm:$0xff]  ;;  %s144_s26 = sshll.u32 %s246_s25, 4  ;;  %s145_s26 = int_to_ptr.vmem [resolvable:$true] %s144_s26 }
   0xd   :  { %200 = vmatpush3.bf16.msra.mxu0 %v199_v19  ;;  %v209_v34 = vpack.c.bf16 %v43_v32, %v42_v31  ;;  %v26_v35 = vld [vmem:[%s382_s1 + $0x50] sm:$0xff]  ;;  %v27_v36 = vld [vmem:[%s382_s1 + $0x58] sm:$0xff]  ;;  %v45_v38 = vld [vmem:[%s382_s1 + $0xe8] sm:$0xff]  ;;  %s222_s27 = scalar_lea.vmem %s145_s26, 32  ;;  %p227_p1 = scmp.lt.s32.totalorder %s145_s26, %s145_s26 }
   0xe   :  { %202 = vmatprep.subr.bf16.mxu0 %v201_v20  ;;  %v211_v39 = vpack.c.bf16 %v27_v36, %v26_v35  ;;  %v213_v40 = vpack.c.bf16 %v45_v38, %v44_v37  ;;  %v28_v41 = vld [vmem:[%s382_s1 + $0x60] sm:$0xff]  ;;  %v29_v42 = vld [vmem:[%s382_s1 + $0x68] sm:$0xff]  ;;  %v46_v43 = vld [vmem:[%s382_s1 + $0xf0] sm:$0xff]  ;;  %p223_p0 = scmp.ne.s32.totalorder %s145_s26, %s222_s27  ;;  %p228_p2 = scmp.lt.s32.totalorder %s222_s27, %s222_s27 }
   0xf   :  { %v47_v44 = vld [vmem:[%s382_s1 + $0xf8] sm:$0xff]  ;;  %v215_v45 = vpack.c.bf16 %v29_v42, %v28_v41  ;;  %v30_v47 = vld [vmem:[%s382_s1 + $0x70] sm:$0xff]  ;;  %v152_v51 = vld [vmem:[%s383_s2] ss:$0 sm:$0xff] }
  0x10   :  { %v217_v46 = vpack.c.bf16 %v47_v44, %v46_v43  ;;  %v31_v48 = vld [vmem:[%s382_s1 + $0x78] sm:$0xff]  ;;  %p229_p3 = por %p228_p2, %p227_p1 }
  0x11   :  { %204 = vmatpush3.bf16.msra.mxu0 %v203_v27  ;;  %v219_v49 = vpack.c.bf16 %v31_v48, %v30_v47 }
  0x12   :  { %206 = vmatprep.subr.bf16.mxu0 %v205_v28  ;;  %p230_p4 = pnand %p229_p3, %p223_p0 }
  0x15   :  { %208 = vmatpush3.bf16.msra.mxu0 %v207_v33 }
  0x16   :  { %210 = vmatprep.subr.bf16.mxu0 %v209_v34 }
  0x19   :  { %212 = vmatpush3.bf16.msra.mxu0 %v211_v39 }
  0x1a   :  { %214 = vmatprep.subr.bf16.mxu0 %v213_v40 }
  0x1d   :  { %216 = vmatpush3.bf16.msra.mxu0 %v215_v45 }
  0x1e   :  { %218 = vmatprep.subr.bf16.mxu0 %v217_v46 }
  0x21   :  { %220 = vmatpush3.bf16.msra.mxu0 %v219_v49 }
  0x24   :  { %131 = vmatmul.mubr.f32.vlgmr.msra.gmra.mrb[0].mxu0 %v153_v25 }
  0xf7   :  { %v186_v50 = vpop.f32.mrb[0].mxu0 }
  0xf8   :  { %v187_v52 = vpop.f32.mrb[1].mxu0 }
  0xf9   :  { %v188_v53 = vadd.f32 %v187_v52, %v186_v50 }
  0xfb   :  { %v133_v54 = vadd.f32 %v188_v53, %v152_v51 }
  0xfd   :  { %137 = vst.msk [vmem:[#allocation2] sm:$0x3] %vm136_vm0, %v133_v54 }
  0xfe   :  { %233 = shalt.err (!%p230_p4)
}
  0xff   :  { %s234_s0 = scalar_lea.hbm %s384_s3, 32 }
 0x100   :  { %p235_p5 = scmp.ne.s32.totalorder %s384_s3, %s234_s0  ;;  %p238_p6 = scmp.lt.u32.totalorder %s234_s0, %s384_s3 }
 0x102   :  { %p240_p7 = pnand %p238_p6, %p235_p5 }
 0x104   :  { %243 = shalt.err (!%p240_p7)
}
 0x105   :  { %147 = dma.vmem_to_hbm [thread:$0]  %s145_s26, 32, %s384_s3, [#allocation3]  }
 0x106   :  { %244 = dma.done.wait [#allocation3], 32  }
 0x107   :  { %245 = vsyncadd [#allocation3], 4294967264 }
 0x108   :  { %151 = vsyncpa [#allocation3], 1 }

</bundles_post_ra>
